<compile_context>
chip_gen: v5e
topology: v5e:2x2
jax: 0.10.0
libtpu: 0.0.40
codegen_flags: <defaults>
</compile_context>

<pallas_src>
import jax
import jax.numpy as jnp
from jax import lax
from jax.experimental import pallas as pl
from jax.experimental.pallas import tpu as pltpu

LANE = 128
N_MAT = 6                      # number of 128x128 matrix blocks in the param slab
VBASE = N_MAT * LANE           # first row of the row-vector block
N_VEC_ROWS = 16                # 10 used, padded to a multiple of 8

# matrix-block indices inside the param slab
M_PD_W2, M_PO_W2, M_WD, M_WO, M_WS, M_O_W2 = 0, 1, 2, 3, 4, 5
# row-vector indices (rows VBASE + i)
V_PD_W1, V_PD_B1, V_PD_B2 = 0, 1, 2
V_PO_W1, V_PO_B1, V_PO_B2 = 3, 4, 5
V_S_W1, V_S_B1 = 6, 7
V_B1_FUSED, V_O_B2 = 8, 9


def _round_up(x, m):
    return -(-x // m) * m


def scalar_model_kernel(p_ref, fdat_ref, idx_ref, out_ref):
    BP = out_ref.shape[0]          # padded batch rows (multiple of 8)
    NMAX = fdat_ref.shape[0]       # padded node/edge rows (multiple of 8)

    def mat(i):                    # [128,128] zero-padded weight block (static slice, aligned)
        return p_ref[i * LANE:(i + 1) * LANE, :]

    def vec(i):                    # [1,128] zero-padded bias / Linear(1->H) weight row
        return p_ref[VBASE + i:VBASE + i + 1, :]

    def deepset_branch(data_col, idx_row, m_w2, v_w1, v_b1, v_b2):
        # phi layer 1: Linear(1->H)+ReLU on the VPU (K=1 matmul would waste an MXU pass).
        x = fdat_ref[:, data_col:data_col + 1]                 # [NMAX, 1]
        h = jnp.maximum(x * vec(v_w1) + vec(v_b1), 0.0)        # [NMAX, 128], zeros past H
        # phi layer 2: Linear(H->2H) on the MXU (operands zero-padded to 128 lanes).
        feats = jnp.dot(h, mat(m_w2),
                        preferred_element_type=jnp.float32) + vec(v_b2)   # [NMAX,128]
        # segment (scatter-add) sum expressed as a one-hot matmul on the MXU.
        bidx = idx_ref[idx_row:idx_row + 1, :]                 # [1, NMAX] int32 (-1 = pad)
        seg = lax.broadcasted_iota(jnp.int32, (BP, NMAX), 0)   # [BP, NMAX]
        onehot = (seg == bidx).astype(jnp.float32)
        return jnp.dot(onehot, feats,
                       preferred_element_type=jnp.float32)     # [BP, 128], zeros past 2H

    agg_d = deepset_branch(0, 0, M_PD_W2, V_PD_W1, V_PD_B1, V_PD_B2)
    agg_o = deepset_branch(1, 1, M_PO_W2, V_PO_W1, V_PO_B1, V_PO_B2)

    # MLP_s layer 1: Linear(1->H)+ReLU on the VPU.
    fs = fdat_ref[0:BP, 2:3]                                   # [BP, 1]
    hs = jnp.maximum(fs * vec(V_S_W1) + vec(V_S_B1), 0.0)      # [BP, 128], zeros past H

    # Fused (rho_d | rho_o | MLP_s layer2) + MLP_out layer1, decomposed: no concat,
    # three independent small matmuls accumulating in f32, then one ReLU.
    ho = jnp.dot(agg_d, mat(M_WD), preferred_element_type=jnp.float32)
    ho = ho + jnp.dot(agg_o, mat(M_WO), preferred_element_type=jnp.float32)
    ho = ho + jnp.dot(hs, mat(M_WS), preferred_element_type=jnp.float32)
    ho = jnp.maximum(ho + vec(V_B1_FUSED), 0.0)                # [BP, 128], zeros past H

    # MLP_out layer 2: Linear(H->out), lane-dense [BP,128] store (real cols = 0:out_dim).
    out_ref[...] = (jnp.dot(ho, mat(M_O_W2), preferred_element_type=jnp.float32)
                    + vec(V_O_B2))


# ---------------- wrapper: parameter / data packing + pallas_call ----------------

def pack_params(params, hid_dim, out_dim):
    """Fold rho_*/MLP_s-layer2 into MLP_out layer1 and pack into one [784,128] slab."""
    H = hid_dim
    assert 2 * H <= LANE and 3 * H <= 3 * LANE and out_dim <= LANE and H % 8 == 0
    (pd_w1, pd_b1, pd_w2, pd_b2, rd_w, rd_b,
     po_w1, po_b1, po_w2, po_b2, ro_w, ro_b,
     s_w1, s_b1, s_w2, s_b2,
     o_w1, o_b1, o_w2, o_b2) = params

    # Exact algebraic fold: no nonlinearity between rho / MLP_s layer2 and MLP_out layer1.
    w1_d, w1_o, w1_s = o_w1[:H], o_w1[H:2 * H], o_w1[2 * H:3 * H]
    Wd = rd_w @ w1_d                                            # [2H, H]
    Wo = ro_w @ w1_o                                            # [2H, H]
    Ws = s_w2 @ w1_s                                            # [H, H]
    b1_fused = rd_b @ w1_d + ro_b @ w1_o + s_b2 @ w1_s + o_b1   # [1, H]

    def padm(m):
        out = jnp.zeros((LANE, LANE), jnp.float32)
        return out.at[:m.shape[0], :m.shape[1]].set(m)

    def padv(v):
        out = jnp.zeros((1, LANE), jnp.float32)
        return out.at[:, :v.shape[1]].set(v)

    mats = [None] * N_MAT
    mats[M_PD_W2], mats[M_PO_W2] = pd_w2, po_w2
    mats[M_WD], mats[M_WO], mats[M_WS], mats[M_O_W2] = Wd, Wo, Ws, o_w2
    vecs = [None] * 10
    vecs[V_PD_W1], vecs[V_PD_B1], vecs[V_PD_B2] = pd_w1, pd_b1, pd_b2
    vecs[V_PO_W1], vecs[V_PO_B1], vecs[V_PO_B2] = po_w1, po_b1, po_b2
    vecs[V_S_W1], vecs[V_S_B1] = s_w1, s_b1
    vecs[V_B1_FUSED], vecs[V_O_B2] = b1_fused, o_b2

    rows = [padm(m) for m in mats] + [padv(v) for v in vecs]
    rows.append(jnp.zeros((N_VEC_ROWS - len(vecs), LANE), jnp.float32))
    return jnp.concatenate(rows, axis=0)                        # [6*128+16, 128]


def pack_data(f_d, batch_d, f_o, edge_batch, f_star, batch_size):
    B = batch_size
    nmax = _round_up(max(f_d.shape[0], f_o.shape[0], _round_up(B, 8)), 8)
    fdat = jnp.zeros((nmax, 8), jnp.float32)
    fdat = fdat.at[:f_d.shape[0], 0].set(f_d[:, 0])
    fdat = fdat.at[:f_o.shape[0], 1].set(f_o[:, 0])
    fdat = fdat.at[:B, 2].set(f_star[:, 0])
    idx = jnp.full((8, nmax), -1, jnp.int32)     # -1 sentinel: padded rows never match a segment
    idx = idx.at[0, :f_d.shape[0]].set(batch_d[0])
    idx = idx.at[1, :f_o.shape[0]].set(edge_batch[0])
    return fdat, idx


def scalar_model_forward(inputs, params, *, batch_size, hid_dim, out_dim):
    f_d, batch_d, f_o, edge_batch, f_star = inputs
    p_slab = pack_params(params, hid_dim, out_dim)
    fdat, idx = pack_data(f_d, batch_d, f_o, edge_batch, f_star, batch_size)
    bp = _round_up(batch_size, 8)
    vmem = pl.BlockSpec(memory_space=pltpu.MemorySpace.VMEM)
    out = pl.pallas_call(
        scalar_model_kernel,
        out_shape=jax.ShapeDtypeStruct((bp, LANE), jnp.float32),
        in_specs=[vmem, vmem, vmem],
        out_specs=vmem,
    )(p_slab, fdat, idx)
    return out[:batch_size, :out_dim]


# ---------------- deterministic parameter construction ----------------

def _init_linear(key, fan_in, fan_out):
    kw, kb = jax.random.split(key)
    bound = 1.0 / (fan_in ** 0.5)
    w = jax.random.uniform(kw, (fan_in, fan_out), jnp.float32, -bound, bound)
    b = jax.random.uniform(kb, (1, fan_out), jnp.float32, -bound, bound)
    return w, b


def make_params(key, hid_dim, out_dim):
    ks = jax.random.split(key, 10)
    params = []
    # deepset_d: phi = [1->H, H->2H], rho = [2H->H]
    params += _init_linear(ks[0], 1, hid_dim)
    params += _init_linear(ks[1], hid_dim, 2 * hid_dim)
    params += _init_linear(ks[2], 2 * hid_dim, hid_dim)
    # deepset_o
    params += _init_linear(ks[3], 1, hid_dim)
    params += _init_linear(ks[4], hid_dim, 2 * hid_dim)
    params += _init_linear(ks[5], 2 * hid_dim, hid_dim)
    # MLP_s: [1->H, H->H]
    params += _init_linear(ks[6], 1, hid_dim)
    params += _init_linear(ks[7], hid_dim, hid_dim)
    # MLP_out: [3H->H, H->out]
    params += _init_linear(ks[8], 3 * hid_dim, hid_dim)
    params += _init_linear(ks[9], hid_dim, out_dim)
    return params


# ---------------- pure-JAX reference (unfused, for correctness check) ----------------

def reference_forward(inputs, params, batch_size):
    f_d, bidx_d, f_o, bidx_o, f_star = inputs
    (pd_w1, pd_b1, pd_w2, pd_b2, rd_w, rd_b,
     po_w1, po_b1, po_w2, po_b2, ro_w, ro_b,
     s_w1, s_b1, s_w2, s_b2,
     o_w1, o_b1, o_w2, o_b2) = params

    def mlp2(x, w1, b1, w2, b2):
        return jnp.maximum(x @ w1 + b1, 0.0) @ w2 + b2

    def deepset(f, bidx, w1, b1, w2, b2, rw, rb):
        feats = mlp2(f, w1, b1, w2, b2)
        agg = jax.ops.segment_sum(feats, bidx[0], num_segments=batch_size)
        return agg @ rw + rb

    out_d = deepset(f_d, bidx_d, pd_w1, pd_b1, pd_w2, pd_b2, rd_w, rd_b)
    out_o = deepset(f_o, bidx_o, po_w1, po_b1, po_w2, po_b2, ro_w, ro_b)
    out_star = mlp2(f_star, s_w1, s_b1, s_w2, s_b2)
    return mlp2(jnp.concatenate([out_d, out_o, out_star], -1),
                o_w1, o_b1, o_w2, o_b2)


if __name__ == "__main__":
    HID, OUT = 32, 4
    B, N_D, N_O = 2, 16, 32

    key = jax.random.PRNGKey(0)
    k_fd, k_fo, k_fs, k_params = jax.random.split(key, 4)

    f_d = jax.random.normal(k_fd, (N_D, 1), jnp.float32)
    f_o = jax.random.normal(k_fo, (N_O, 1), jnp.float32)
    f_star = jax.random.normal(k_fs, (B, 1), jnp.float32)
    batch_d = jnp.repeat(jnp.arange(B, dtype=jnp.int32), N_D // B)[None, :]     # [1, N_d]
    edge_batch = jnp.repeat(jnp.arange(B, dtype=jnp.int32), N_O // B)[None, :]  # [1, N_o]

    params = make_params(k_params, HID, OUT)
    inputs = (f_d, batch_d, f_o, edge_batch, f_star)

    out = scalar_model_forward(inputs, params, batch_size=B, hid_dim=HID, out_dim=OUT)
    out = jax.block_until_ready(out)

    ref = reference_forward(inputs, params, B)
    assert out.shape == (B, OUT)
    assert jnp.allclose(out, ref, atol=1e-4, rtol=1e-4), (out, ref)

    print("KERNEL_OK")
</pallas_src>

<mosaic_0001>
module attributes {stable_mosaic.version = 11 : i64} {
  func.func @scalar_model_kernel(%arg0: memref<784x128xf32, #tpu.memory_space<vmem>>, %arg1: memref<32x8xf32, #tpu.memory_space<vmem>>, %arg2: memref<8x32xi32, #tpu.memory_space<vmem>>, %arg3: memref<8x128xf32, #tpu.memory_space<vmem>>) attributes {dimension_semantics = [], scalar_prefetch = 0 : i64, scratch_operands = 0 : i64, tpu.core_type = #tpu.core_type<tc>} {
    %c0 = arith.constant 0 : index
    %c0_0 = arith.constant 0 : index
    %0 = vector.load %arg1[%c0, %c0_0] : memref<32x8xf32, #tpu.memory_space<vmem>>, vector<32x1xf32>
    %c768 = arith.constant 768 : index
    %c0_1 = arith.constant 0 : index
    %1 = vector.load %arg0[%c768, %c0_1] : memref<784x128xf32, #tpu.memory_space<vmem>>, vector<1x128xf32>
    %2 = vector.broadcast %0 : vector<32x1xf32> to vector<32x128xf32>
    %3 = vector.broadcast %1 : vector<1x128xf32> to vector<32x128xf32>
    %4 = arith.mulf %2, %3 : vector<32x128xf32>
    %c769 = arith.constant 769 : index
    %c0_2 = arith.constant 0 : index
    %5 = vector.load %arg0[%c769, %c0_2] : memref<784x128xf32, #tpu.memory_space<vmem>>, vector<1x128xf32>
    %6 = vector.broadcast %5 : vector<1x128xf32> to vector<32x128xf32>
    %7 = arith.addf %4, %6 : vector<32x128xf32>
    %cst = arith.constant 0.000000e+00 : f32
    %8 = vector.broadcast %cst : f32 to vector<32x128xf32>
    %9 = arith.maximumf %7, %8 : vector<32x128xf32>
    %c0_3 = arith.constant 0 : index
    %c0_4 = arith.constant 0 : index
    %10 = vector.load %arg0[%c0_3, %c0_4] : memref<784x128xf32, #tpu.memory_space<vmem>>, vector<128x128xf32>
    %cst_5 = arith.constant dense<0.000000e+00> : vector<32x128xf32>
    %11 = tpu.matmul %9, %10, %cst_5 {dimension_numbers = #tpu.dot_dimension_numbers<[1], [0], [0], [1], [0, 0, 1, 1], [], []>} : vector<32x128xf32>, vector<128x128xf32>, vector<32x128xf32> -> vector<32x128xf32>
    %c770 = arith.constant 770 : index
    %c0_6 = arith.constant 0 : index
    %12 = vector.load %arg0[%c770, %c0_6] : memref<784x128xf32, #tpu.memory_space<vmem>>, vector<1x128xf32>
    %13 = vector.broadcast %12 : vector<1x128xf32> to vector<32x128xf32>
    %14 = arith.addf %11, %13 : vector<32x128xf32>
    %c0_7 = arith.constant 0 : index
    %c0_8 = arith.constant 0 : index
    %15 = vector.load %arg2[%c0_7, %c0_8] : memref<8x32xi32, #tpu.memory_space<vmem>>, vector<1x32xi32>
    %16 = tpu.iota {dimensions = array<i32: 0>} : vector<8x32xi32>
    %17 = vector.broadcast %15 : vector<1x32xi32> to vector<8x32xi32>
    %18 = arith.cmpi eq, %16, %17 : vector<8x32xi32>
    %19 = arith.extui %18 : vector<8x32xi1> to vector<8x32xi32>
    %20 = arith.sitofp %19 : vector<8x32xi32> to vector<8x32xf32>
    %cst_9 = arith.constant dense<0.000000e+00> : vector<8x128xf32>
    %21 = tpu.matmul %20, %14, %cst_9 {dimension_numbers = #tpu.dot_dimension_numbers<[1], [0], [0], [1], [0, 0, 1, 1], [], []>} : vector<8x32xf32>, vector<32x128xf32>, vector<8x128xf32> -> vector<8x128xf32>
    %c0_10 = arith.constant 0 : index
    %c1 = arith.constant 1 : index
    %22 = vector.load %arg1[%c0_10, %c1] : memref<32x8xf32, #tpu.memory_space<vmem>>, vector<32x1xf32>
    %c771 = arith.constant 771 : index
    %c0_11 = arith.constant 0 : index
    %23 = vector.load %arg0[%c771, %c0_11] : memref<784x128xf32, #tpu.memory_space<vmem>>, vector<1x128xf32>
    %24 = vector.broadcast %22 : vector<32x1xf32> to vector<32x128xf32>
    %25 = vector.broadcast %23 : vector<1x128xf32> to vector<32x128xf32>
    %26 = arith.mulf %24, %25 : vector<32x128xf32>
    %c772 = arith.constant 772 : index
    %c0_12 = arith.constant 0 : index
    %27 = vector.load %arg0[%c772, %c0_12] : memref<784x128xf32, #tpu.memory_space<vmem>>, vector<1x128xf32>
    %28 = vector.broadcast %27 : vector<1x128xf32> to vector<32x128xf32>
    %29 = arith.addf %26, %28 : vector<32x128xf32>
    %cst_13 = arith.constant 0.000000e+00 : f32
    %30 = vector.broadcast %cst_13 : f32 to vector<32x128xf32>
    %31 = arith.maximumf %29, %30 : vector<32x128xf32>
    %c128 = arith.constant 128 : index
    %c0_14 = arith.constant 0 : index
    %32 = vector.load %arg0[%c128, %c0_14] : memref<784x128xf32, #tpu.memory_space<vmem>>, vector<128x128xf32>
    %cst_15 = arith.constant dense<0.000000e+00> : vector<32x128xf32>
    %33 = tpu.matmul %31, %32, %cst_15 {dimension_numbers = #tpu.dot_dimension_numbers<[1], [0], [0], [1], [0, 0, 1, 1], [], []>} : vector<32x128xf32>, vector<128x128xf32>, vector<32x128xf32> -> vector<32x128xf32>
    %c773 = arith.constant 773 : index
    %c0_16 = arith.constant 0 : index
    %34 = vector.load %arg0[%c773, %c0_16] : memref<784x128xf32, #tpu.memory_space<vmem>>, vector<1x128xf32>
    %35 = vector.broadcast %34 : vector<1x128xf32> to vector<32x128xf32>
    %36 = arith.addf %33, %35 : vector<32x128xf32>
    %c1_17 = arith.constant 1 : index
    %c0_18 = arith.constant 0 : index
    %37 = vector.load %arg2[%c1_17, %c0_18] : memref<8x32xi32, #tpu.memory_space<vmem>>, vector<1x32xi32>
    %38 = tpu.iota {dimensions = array<i32: 0>} : vector<8x32xi32>
    %39 = vector.broadcast %37 : vector<1x32xi32> to vector<8x32xi32>
    %40 = arith.cmpi eq, %38, %39 : vector<8x32xi32>
    %41 = arith.extui %40 : vector<8x32xi1> to vector<8x32xi32>
    %42 = arith.sitofp %41 : vector<8x32xi32> to vector<8x32xf32>
    %cst_19 = arith.constant dense<0.000000e+00> : vector<8x128xf32>
    %43 = tpu.matmul %42, %36, %cst_19 {dimension_numbers = #tpu.dot_dimension_numbers<[1], [0], [0], [1], [0, 0, 1, 1], [], []>} : vector<8x32xf32>, vector<32x128xf32>, vector<8x128xf32> -> vector<8x128xf32>
    %c0_20 = arith.constant 0 : index
    %c2 = arith.constant 2 : index
    %44 = vector.load %arg1[%c0_20, %c2] : memref<32x8xf32, #tpu.memory_space<vmem>>, vector<8x1xf32>
    %c774 = arith.constant 774 : index
    %c0_21 = arith.constant 0 : index
    %45 = vector.load %arg0[%c774, %c0_21] : memref<784x128xf32, #tpu.memory_space<vmem>>, vector<1x128xf32>
    %46 = vector.broadcast %44 : vector<8x1xf32> to vector<8x128xf32>
    %47 = vector.broadcast %45 : vector<1x128xf32> to vector<8x128xf32>
    %48 = arith.mulf %46, %47 : vector<8x128xf32>
    %c775 = arith.constant 775 : index
    %c0_22 = arith.constant 0 : index
    %49 = vector.load %arg0[%c775, %c0_22] : memref<784x128xf32, #tpu.memory_space<vmem>>, vector<1x128xf32>
    %50 = vector.broadcast %49 : vector<1x128xf32> to vector<8x128xf32>
    %51 = arith.addf %48, %50 : vector<8x128xf32>
    %cst_23 = arith.constant 0.000000e+00 : f32
    %52 = vector.broadcast %cst_23 : f32 to vector<8x128xf32>
    %53 = arith.maximumf %51, %52 : vector<8x128xf32>
    %c256 = arith.constant 256 : index
    %c0_24 = arith.constant 0 : index
    %54 = vector.load %arg0[%c256, %c0_24] : memref<784x128xf32, #tpu.memory_space<vmem>>, vector<128x128xf32>
    %cst_25 = arith.constant dense<0.000000e+00> : vector<8x128xf32>
    %55 = tpu.matmul %21, %54, %cst_25 {dimension_numbers = #tpu.dot_dimension_numbers<[1], [0], [0], [1], [0, 0, 1, 1], [], []>} : vector<8x128xf32>, vector<128x128xf32>, vector<8x128xf32> -> vector<8x128xf32>
    %c384 = arith.constant 384 : index
    %c0_26 = arith.constant 0 : index
    %56 = vector.load %arg0[%c384, %c0_26] : memref<784x128xf32, #tpu.memory_space<vmem>>, vector<128x128xf32>
    %cst_27 = arith.constant dense<0.000000e+00> : vector<8x128xf32>
    %57 = tpu.matmul %43, %56, %cst_27 {dimension_numbers = #tpu.dot_dimension_numbers<[1], [0], [0], [1], [0, 0, 1, 1], [], []>} : vector<8x128xf32>, vector<128x128xf32>, vector<8x128xf32> -> vector<8x128xf32>
    %58 = arith.addf %55, %57 : vector<8x128xf32>
    %c512 = arith.constant 512 : index
    %c0_28 = arith.constant 0 : index
    %59 = vector.load %arg0[%c512, %c0_28] : memref<784x128xf32, #tpu.memory_space<vmem>>, vector<128x128xf32>
    %cst_29 = arith.constant dense<0.000000e+00> : vector<8x128xf32>
    %60 = tpu.matmul %53, %59, %cst_29 {dimension_numbers = #tpu.dot_dimension_numbers<[1], [0], [0], [1], [0, 0, 1, 1], [], []>} : vector<8x128xf32>, vector<128x128xf32>, vector<8x128xf32> -> vector<8x128xf32>
    %61 = arith.addf %58, %60 : vector<8x128xf32>
    %c776 = arith.constant 776 : index
    %c0_30 = arith.constant 0 : index
    %62 = vector.load %arg0[%c776, %c0_30] : memref<784x128xf32, #tpu.memory_space<vmem>>, vector<1x128xf32>
    %63 = vector.broadcast %62 : vector<1x128xf32> to vector<8x128xf32>
    %64 = arith.addf %61, %63 : vector<8x128xf32>
    %cst_31 = arith.constant 0.000000e+00 : f32
    %65 = vector.broadcast %cst_31 : f32 to vector<8x128xf32>
    %66 = arith.maximumf %64, %65 : vector<8x128xf32>
    %c640 = arith.constant 640 : index
    %c0_32 = arith.constant 0 : index
    %67 = vector.load %arg0[%c640, %c0_32] : memref<784x128xf32, #tpu.memory_space<vmem>>, vector<128x128xf32>
    %cst_33 = arith.constant dense<0.000000e+00> : vector<8x128xf32>
    %68 = tpu.matmul %66, %67, %cst_33 {dimension_numbers = #tpu.dot_dimension_numbers<[1], [0], [0], [1], [0, 0, 1, 1], [], []>} : vector<8x128xf32>, vector<128x128xf32>, vector<8x128xf32> -> vector<8x128xf32>
    %c777 = arith.constant 777 : index
    %c0_34 = arith.constant 0 : index
    %69 = vector.load %arg0[%c777, %c0_34] : memref<784x128xf32, #tpu.memory_space<vmem>>, vector<1x128xf32>
    %70 = vector.broadcast %69 : vector<1x128xf32> to vector<8x128xf32>
    %71 = arith.addf %68, %70 : vector<8x128xf32>
    %c0_35 = arith.constant 0 : index
    %c0_36 = arith.constant 0 : index
    %72 = vector.load %arg3[%c0_35, %c0_36] : memref<8x128xf32, #tpu.memory_space<vmem>>, vector<8x128xf32>
    tpu.vector_store %arg3[%c0_35, %c0_36], %71 {strides = array<i32>} : memref<8x128xf32, #tpu.memory_space<vmem>>, vector<8x128xf32>,
    return
  }
}

</mosaic_0001>

<bundles_post_ra>
// kernel: tpu_custom_call.1
= control target key start
LH: loop header
LB: loop body
LE: loop exit
PB: predicated region body
PF: predicated region fallthrough
CT: control target
= control target key end

     0   :  { %8 = vsyncpa [#allocation3], 0  ;;  %s581_s0 = inlined_call_operand.hbm [shape: f32[784,128], index: 0, kind: input, shape index: {}]   ;;  %s582_s1 = inlined_call_operand.vmem [shape: f32[32,8], index: 1, kind: input, shape index: {}]   ;;  %s583_s2 = inlined_call_operand.vmem [shape: s32[8,32], index: 2, kind: input, shape index: {}]   ;;  %s584_s3 = inlined_call_operand.hbm [shape: f32[8,128], index: 3, kind: output, shape index: {}]  }
   0x1   :  { %9 = vsyncpa [#allocation4], 0  ;;  %s14_s14 = sshll.u32 %s581_s0, 4  ;;  %s522_s15 = smov [#allocation2]   ;;  %s15_s14 = int_to_ptr.hbm [resolvable:$true] %s14_s14 }
   0x2   :  { %s16_s16 = sshll.u32 %s522_s15, 4  ;;  %s523_s17 = smov 128   ;;  %s17_s16 = int_to_ptr.vmem [resolvable:$true] %s16_s16 }
   0x3   :  { %s524_s18 = smov 8  }
   0x4   :  { %22 = dma.hbm_to_vmem [thread:$0]  %s15_s14, 12544, %s17_s16, [#allocation3], %s523_s17, %s523_s17, %s524_s18  }
   0x5   :  { %518 = dma.done.wait [#allocation3], 12544  }
   0x6   :  { %519 = vsyncadd [#allocation3], 4294954752  ;;  %v525_v0 = vmov 1   ;;  %v556_v1 = vld [vmem:[%s582_s1] sm:$0xff]  ;;  %v32_v2 = vld [vmem:[%s582_s1 + $0x8] sm:$0xff]  ;;  %v526_v14 = vmov 0  }
   0x7   :  { %450 = vset.pattern.permute.xlu0 %v525_v0  ;;  %452 = vset.pattern.permute.xlu1 %v525_v0  ;;  %v33_v3 = vld [vmem:[%s582_s1 + $0x10] sm:$0xff]  ;;  %v196_v4 = vld [vmem:[#allocation2 + $0xf8] sm:$0xff]  ;;  %v194_v6 = vld [vmem:[#allocation2 + $0xe8] sm:$0xff]  ;;  %vm125_vm2 = vcmask 261120   ;;  %s428_s5 = sshll.u32 %s584_s3, 4  ;;  %s429_s5 = int_to_ptr.hbm [resolvable:$true] %s428_s5 }
   0x8   :  { %454 = vset.pattern.permute.xlu2 %v525_v0  ;;  %151 = vperm.xlu0 %450, %v556_v1   ;;  %v195_v5 = vld [vmem:[#allocation2 + $0xf0] sm:$0xff]  ;;  %v86_v7 = vld [vmem:[#allocation2 + $0x78] sm:$0xff]  ;;  %v193_v9 = vld [vmem:[#allocation2 + $0xe0] sm:$0xff] }
   0x9   :  { %155 = vperm.xlu1 %452, %v32_v2   ;;  %159 = vperm.xlu2 %454, %v33_v3   ;;  %v85_v8 = vld [vmem:[#allocation2 + $0x70] sm:$0xff]  ;;  %v84_v10 = vld [vmem:[#allocation2 + $0x68] sm:$0xff]  ;;  %v192_v11 = vld [vmem:[#allocation2 + $0xd8] sm:$0xff] }
   0xa   :  { %199 = vmatpush.msra.mxu2 %v196_v4  ;;  %89 = vmatpush.msra.mxu0 %v86_v7  ;;  %v191_v12 = vld [vmem:[#allocation2 + $0xd0] sm:$0xff]  ;;  %v83_v13 = vld [vmem:[#allocation2 + $0x60] sm:$0xff]  ;;  %v82_v15 = vld [vmem:[#allocation2 + $0x58] sm:$0xff] }
   0xb   :  { %v190_v16 = vld [vmem:[#allocation2 + $0xc8] sm:$0xff]  ;;  %v81_v17 = vld [vmem:[#allocation2 + $0x50] sm:$0xff]  ;;  %v189_v18 = vld [vmem:[#allocation2 + $0xc0] sm:$0xff] }
   0xc   :  { %200 = vmatpush.msra.mxu2 %v195_v5  ;;  %90 = vmatpush.msra.mxu0 %v85_v8  ;;  %v80_v19 = vld [vmem:[#allocation2 + $0x48] sm:$0xff]  ;;  %v34_v20 = vld [vmem:[%s582_s1 + $0x18] sm:$0xff]  ;;  %v79_v22 = vld [vmem:[#allocation2 + $0x40] sm:$0xff] }
   0xd   :  { %v188_v21 = vld [vmem:[#allocation2 + $0xb8] sm:$0xff]  ;;  %v187_v23 = vld [vmem:[#allocation2 + $0xb0] sm:$0xff]  ;;  %v186_v24 = vld [vmem:[#allocation2 + $0xa8] sm:$0xff] }
   0xe   :  { %201 = vmatpush.msra.mxu2 %v194_v6  ;;  %91 = vmatpush.msra.mxu0 %v84_v10  ;;  %v185_v25 = vld [vmem:[#allocation2 + $0xa0] sm:$0xff]  ;;  %v184_v26 = vld [vmem:[#allocation2 + $0x98] sm:$0xff]  ;;  %v183_v28 = vld [vmem:[#allocation2 + $0x90] sm:$0xff] }
   0xf   :  { %v78_v27 = vld [vmem:[#allocation2 + $0x38] sm:$0xff]  ;;  %v77_v29 = vld [vmem:[#allocation2 + $0x30] sm:$0xff]  ;;  %v182_v30 = vld [vmem:[#allocation2 + $0x88] sm:$0xff] }
  0x10   :  { %202 = vmatpush.msra.mxu2 %v193_v9  ;;  %451 = vset.pattern.permute.xlu0 %v526_v14  ;;  %v76_v31 = vld [vmem:[#allocation2 + $0x28] sm:$0xff]  ;;  %v181_v32 = vld [vmem:[#allocation2 + $0x80] sm:$0xff]  ;;  %v74_v34 = vld [vmem:[#allocation2 + $0x18] sm:$0xff] }
  0x11   :  { %453 = vset.pattern.permute.xlu1 %v526_v14  ;;  %38 = vperm.xlu0 %451, %v556_v1   ;;  %v75_v33 = vld [vmem:[#allocation2 + $0x20] sm:$0xff]  ;;  %v73_v35 = vld [vmem:[#allocation2 + $0x10] sm:$0xff]  ;;  %v72_v36 = vld [vmem:[#allocation2 + $0x8] sm:$0xff] }
  0x12   :  { %43 = vperm.xlu1 %453, %v32_v2   ;;  %455 = vset.pattern.permute.xlu2 %v526_v14  ;;  %v71_v37 = vld [vmem:[#allocation2] sm:$0xff] }
  0x13   :  { %203 = vmatpush.msra.mxu2 %v192_v11  ;;  %48 = vperm.xlu2 %455, %v33_v3   ;;  %v458_v38 = vld [vmem:[#allocation2 + $0x303] ss:$0 sm:$0xff]  ;;  %v459_v39 = vld [vmem:[#allocation2 + $0x304] ss:$0 sm:$0xff]  ;;  %v460_v46 = vld [vmem:[#allocation2 + $0x300] ss:$0 sm:$0xff] }
  0x14   :  { %92 = vmatpush.msra.mxu0 %v83_v13  ;;  %v461_v49 = vld [vmem:[#allocation2 + $0x301] ss:$0 sm:$0xff]  ;;  %v527_v13 = vmov 2  }
  0x15   :  { %204 = vmatpush.msra.mxu2 %v191_v12 }
  0x16   :  { %93 = vmatpush.msra.mxu0 %v82_v15  ;;  %v356_v15 = vld [vmem:[#allocation2 + $0x278] sm:$0xff] }
  0x17   :  { %205 = vmatpush.msra.mxu2 %v190_v16 }
  0x18   :  { %94 = vmatpush.msra.mxu0 %v81_v17  ;;  %v355_v17 = vld [vmem:[#allocation2 + $0x270] sm:$0xff] }
  0x19   :  { %206 = vmatpush.msra.mxu2 %v189_v18  ;;  %457 = vset.pattern.permute.xlu0 %v527_v13  ;;  %v354_v18 = vld [vmem:[#allocation2 + $0x268] sm:$0xff]  ;;  %v269_v13 = vld [vmem:[#allocation2 + $0x100] sm:$0xff] }
  0x1a   :  { %456 = vset.pattern.permute.xlu1 %v525_v0  ;;  %95 = vmatpush.msra.mxu0 %v80_v19  ;;  %v353_v19 = vld [vmem:[#allocation2 + $0x260] sm:$0xff] }
  0x1b   :  { %163 = vperm.xlu1 %456, %v34_v20   ;;  %207 = vmatpush.msra.mxu2 %v188_v21  ;;  %v352_v21 = vld [vmem:[#allocation2 + $0x258] sm:$0xff] }
  0x1c   :  { %53 = vperm.xlu2 %455, %v34_v20   ;;  %96 = vmatpush.msra.mxu0 %v79_v22 }
  0x1d   :  { %208 = vmatpush.msra.mxu2 %v187_v23  ;;  %260 = vperm.xlu0 %457, %v556_v1   ;;  %v351_v23 = vld [vmem:[#allocation2 + $0x250] sm:$0xff]  ;;  %v462_v1 = vld [vmem:[#allocation2 + $0x305] ss:$0 sm:$0xff] }
  0x1e   :  { %97 = vmatpush.msra.mxu0 %v78_v27 }
  0x1f   :  { %209 = vmatpush.msra.mxu2 %v186_v24  ;;  %v119_v24 = vlaneseq }
  0x20   :  { %98 = vmatpush.msra.mxu0 %v77_v29  ;;  %v465_v29 = vld [vmem:[%s583_s2 + $0x1] ss:$0 sm:$0xff] }
  0x21   :  { %210 = vmatpush.msra.mxu2 %v185_v25  ;;  %v350_v25 = vld [vmem:[#allocation2 + $0x248] sm:$0xff] }
  0x22   :  { %99 = vmatpush.msra.mxu0 %v76_v31  ;;  %v348_v31 = vld [vmem:[#allocation2 + $0x238] sm:$0xff] }
  0x23   :  { %211 = vmatpush.msra.mxu2 %v184_v26  ;;  %v349_v26 = vld [vmem:[#allocation2 + $0x240] sm:$0xff] }
  0x24   :  { %100 = vmatpush.msra.mxu0 %v75_v33 }
  0x25   :  { %212 = vmatpush.msra.mxu2 %v183_v28  ;;  %v120_v28 = vshrl.u32 %v119_v24, 7  ;;  %v397_v24 = vld [vmem:[#allocation2 + $0x2f8] sm:$0xff] }
  0x26   :  { %101 = vmatpush.msra.mxu0 %v74_v34 }
  0x27   :  { %213 = vmatpush.msra.mxu2 %v182_v30  ;;  %vm230_vm0 = vcmp.eq.s32.totalorder %v120_v28, %v465_v29  ;;  %v394_v29 = vld [vmem:[#allocation2 + $0x2e0] sm:$0xff] }
  0x28   :  { %102 = vmatpush.msra.mxu0 %v73_v35  ;;  %v464_v35 = vld [vmem:[%s583_s2] ss:$0 sm:$0xff]  ;;  %s529_s2 = smov [#allocation5]  }
  0x29   :  { %214 = vmatpush.msra.mxu2 %v181_v32  ;;  %v463_v32 = vld [vmem:[#allocation2 + $0x302] ss:$0 sm:$0xff]  ;;  %vm122_vm1 = vcmp.eq.s32.totalorder %v120_v28, %v464_v35  ;;  %v388_v35 = vld [vmem:[#allocation2 + $0x2b0] sm:$0xff]  ;;  %s426_s29 = sshll.u32 %s529_s2, 4  ;;  %s427_s29 = int_to_ptr.vmem [resolvable:$true] %s426_s29 }
  0x2a   :  { %103 = vmatpush.msra.mxu0 %v72_v36  ;;  %v347_v36 = vld [vmem:[#allocation2 + $0x230] sm:$0xff] }
  0x2b   :  { %400 = vmatpush.msrb.mxu2 %v397_v24 }
  0x2c   :  { %104 = vmatpush.msra.mxu0 %v71_v37 }
  0x2e   :  { %357 = vmatpush.msrb.mxu0 %v356_v15  ;;  %v287_v15 = vld [vmem:[#allocation2 + $0x190] sm:$0xff] }
  0x30   :  { %358 = vmatpush.msrb.mxu0 %v355_v17 }
  0x32   :  { %359 = vmatpush.msrb.mxu0 %v354_v18  ;;  %v467_v18 = vld [vmem:[#allocation2 + $0x307] ss:$0 sm:$0xff] }
  0x34   :  { %360 = vmatpush.msrb.mxu0 %v353_v19  ;;  %v343_v19 = vld [vmem:[#allocation2 + $0x210] sm:$0xff] }
  0x36   :  { %361 = vmatpush.msrb.mxu0 %v352_v21 }
  0x38   :  { %362 = vmatpush.msrb.mxu0 %v351_v23  ;;  %v285_v23 = vld [vmem:[#allocation2 + $0x180] sm:$0xff] }
  0x3a   :  { %363 = vmatpush.msrb.mxu0 %v350_v25  ;;  %v396_v25 = vld [vmem:[#allocation2 + $0x2f0] sm:$0xff] }
  0x3b   :  { %401 = vmatpush.msrb.mxu2 %v396_v25 }
  0x3c   :  { %364 = vmatpush.msrb.mxu0 %v349_v26  ;;  %v341_v26 = vld [vmem:[#allocation2 + $0x200] sm:$0xff] }
  0x3e   :  { %365 = vmatpush.msrb.mxu0 %v348_v31  ;;  %v392_v31 = vld [vmem:[#allocation2 + $0x2d0] sm:$0xff] }
  0x40   :  { %366 = vmatpush.msrb.mxu0 %v347_v36  ;;  %v387_v36 = vld [vmem:[#allocation2 + $0x2a8] sm:$0xff] }
  0x63   :  { %v160_v47 = vpop.permute.xlu2 %159 }
  0x64   :  { %v169_v53 = vmul.f32 %v458_v38, %v160_v47 }
  0x66   :  { %v175_v58 = vadd.f32 %v459_v39, %v169_v53  ;;  %v281_v53 = vld [vmem:[#allocation2 + $0x160] sm:$0xff] }
  0x68   :  { %v179_v62 = vmax.f32 %v175_v58, 0.0  ;;  %v296_v58 = vld [vmem:[#allocation2 + $0x1d8] sm:$0xff] }
  0x6d   :  { %v49_v60 = vpop.permute.xlu2 %48 }
  0x6e   :  { %v59_v0 = vmul.f32 %v460_v46, %v49_v60  ;;  %v295_v60 = vld [vmem:[#allocation2 + $0x1d0] sm:$0xff] }
  0x70   :  { %v65_v4 = vadd.f32 %v461_v49, %v59_v0  ;;  %v293_v0 = vld [vmem:[#allocation2 + $0x1c0] sm:$0xff] }
  0x72   :  { %v69_v7 = vmax.f32 %v65_v4, 0.0  ;;  %v274_v4 = vld [vmem:[#allocation2 + $0x128] sm:$0xff] }
  0x76   :  { %v54_v5 = vpop.permute.xlu2 %53 }
  0x77   :  { %v60_v8 = vmul.f32 %v460_v46, %v54_v5  ;;  %v291_v5 = vld [vmem:[#allocation2 + $0x1b0] sm:$0xff] }
  0x79   :  { %v66_v9 = vadd.f32 %v461_v49, %v60_v8  ;;  %v272_v8 = vld [vmem:[#allocation2 + $0x118] sm:$0xff] }
  0x7a   :  { %v152_v40 = vpop.permute.xlu0 %151 }
  0x7b   :  { %v156_v41 = vpop.permute.xlu1 %155  ;;  %v167_v42 = vmul.f32 %v458_v38, %v152_v40  ;;  %v70_v10 = vmax.f32 %v66_v9, 0.0  ;;  %v289_v9 = vld [vmem:[#allocation2 + $0x1a0] sm:$0xff] }
  0x7c   :  { %v168_v44 = vmul.f32 %v458_v38, %v156_v41 }
  0x7d   :  { %v173_v43 = vadd.f32 %v459_v39, %v167_v42  ;;  %v528_v42 = vmov 0.0  }
  0x7e   :  { %v174_v48 = vadd.f32 %v459_v39, %v168_v44  ;;  %v345_v44 = vld [vmem:[#allocation2 + $0x220] sm:$0xff] }
  0x7f   :  { %v177_v45 = vmax.f32 %v173_v43, 0.0  ;;  %v440_v43 = vsel %vm230_vm0, 1.0, %v528_v42 }
  0x80   :  { %v178_v54 = vmax.f32 %v174_v48, 0.0  ;;  %v438_v48 = vsel %vm122_vm1, 1.0, %v528_v42  ;;  %v383_v42 = vld [vmem:[#allocation2 + $0x288] sm:$0xff] }
  0x81   :  { %215 = vmatmul.f32.vlgmr.msra.gmra.mxu2 %v177_v45 }
  0x83   :  { %v39_v50 = vpop.permute.xlu0 %38 }
  0x84   :  { %v44_v51 = vpop.permute.xlu1 %43  ;;  %v57_v52 = vmul.f32 %v460_v46, %v39_v50  ;;  %v300_v50 = vld [vmem:[#allocation2 + $0x1f8] sm:$0xff] }
  0x85   :  { %v58_v55 = vmul.f32 %v460_v46, %v44_v51  ;;  %v284_v46 = vld [vmem:[#allocation2 + $0x178] sm:$0xff]  ;;  %v282_v51 = vld [vmem:[#allocation2 + $0x168] sm:$0xff] }
  0x86   :  { %v63_v56 = vadd.f32 %v461_v49, %v57_v52  ;;  %v299_v52 = vld [vmem:[#allocation2 + $0x1f0] sm:$0xff] }
  0x87   :  { %v64_v59 = vadd.f32 %v461_v49, %v58_v55  ;;  %v283_v49 = vld [vmem:[#allocation2 + $0x170] sm:$0xff]  ;;  %v280_v55 = vld [vmem:[#allocation2 + $0x158] sm:$0xff] }
  0x88   :  { %v67_v57 = vmax.f32 %v63_v56, 0.0  ;;  %v297_v56 = vld [vmem:[#allocation2 + $0x1e0] sm:$0xff] }
  0x89   :  { %218 = vmatmul.f32.gmra.mxu2 %v178_v54  ;;  %v68_v2 = vmax.f32 %v64_v59, 0.0  ;;  %v298_v54 = vld [vmem:[#allocation2 + $0x1e8] sm:$0xff] }
  0x8a   :  { %105 = vmatmul.f32.vlgmr.msra.gmra.mxu0 %v67_v57  ;;  %v279_v57 = vld [vmem:[#allocation2 + $0x150] sm:$0xff]  ;;  %v278_v59 = vld [vmem:[#allocation2 + $0x148] sm:$0xff] }
  0x8d   :  { %v164_v61 = vpop.permute.xlu1 %163 }
  0x8e   :  { %v170_v63 = vmul.f32 %v458_v38, %v164_v61  ;;  %v277_v61 = vld [vmem:[#allocation2 + $0x140] sm:$0xff] }
  0x8f   :  { %v261_v17 = vpop.permute.xlu0 %260 }
  0x90   :  { %v176_v3 = vadd.f32 %v459_v39, %v170_v63  ;;  %v346_v39 = vld [vmem:[#allocation2 + $0x228] sm:$0xff]  ;;  %v276_v63 = vld [vmem:[#allocation2 + $0x138] sm:$0xff] }
  0x91   :  { %221 = vmatmul.f32.gmra.mxu2 %v179_v62  ;;  %367 = vmatpush.msrb.mxu0 %v346_v39  ;;  %v294_v62 = vld [vmem:[#allocation2 + $0x1c8] sm:$0xff] }
  0x92   :  { %108 = vmatmul.f32.gmra.mxu0 %v68_v2  ;;  %v180_v6 = vmax.f32 %v176_v3, 0.0  ;;  %v275_v2 = vld [vmem:[#allocation2 + $0x130] sm:$0xff]  ;;  %v292_v3 = vld [vmem:[#allocation2 + $0x1b8] sm:$0xff] }
  0x93   :  { %368 = vmatpush.msrb.mxu0 %v345_v44 }
  0x99   :  { %224 = vmatmul.f32.gmra.mxu2 %v180_v6  ;;  %v273_v6 = vld [vmem:[#allocation2 + $0x120] sm:$0xff] }
  0x9a   :  { %111 = vmatmul.f32.gmra.mxu0 %v69_v7  ;;  %v290_v7 = vld [vmem:[#allocation2 + $0x1a8] sm:$0xff] }
  0xa2   :  { %114 = vmatmul.f32.gmra.mxu0 %v70_v10  ;;  %v271_v10 = vld [vmem:[#allocation2 + $0x110] sm:$0xff] }
 0x104   :  { %v216_v11 = vpop.f32.mrf.mxu2 }
 0x105   :  { %v217_v41 = vadd.f32 %v462_v1, %v216_v11  ;;  %v270_v11 = vld [vmem:[#allocation2 + $0x108] sm:$0xff] }
 0x107   :  { %v106_v12 = vpop.f32.mrf.mxu0 }
 0x108   :  { %v107_v47 = vadd.f32 %v463_v32, %v106_v12  ;;  %v288_v12 = vld [vmem:[#allocation2 + $0x198] sm:$0xff] }
 0x10c   :  { %v219_v14 = vpop.f32.mrf.mxu2 }
 0x10d   :  { %v220_v38 = vadd.f32 %v462_v1, %v219_v14  ;;  %v344_v14 = vld [vmem:[#allocation2 + $0x218] sm:$0xff] }
 0x10e   :  { %369 = vmatpush.msrb.mxu0 %v344_v14 }
 0x10f   :  { %v109_v16 = vpop.f32.mrf.mxu0 }
 0x110   :  { %v110_v45 = vadd.f32 %v463_v32, %v109_v16  ;;  %v466_v16 = vld [vmem:[#allocation2 + $0x306] ss:$0 sm:$0xff]  ;;  %370 = vmatpush.msrb.mxu0 %v343_v19 }
 0x111   :  { %v264_v21 = vmul.f32 %v466_v16, %v261_v17 }
 0x114   :  { %v222_v20 = vpop.f32.mrf.mxu2 }
 0x115   :  { %v223_v33 = vadd.f32 %v462_v1, %v222_v20  ;;  %v286_v20 = vld [vmem:[#allocation2 + $0x188] sm:$0xff] }
 0x117   :  { %v112_v22 = vpop.f32.mrf.mxu0 }
 0x118   :  { %v113_v40 = vadd.f32 %v463_v32, %v112_v22  ;;  %v342_v22 = vld [vmem:[#allocation2 + $0x208] sm:$0xff] }
 0x119   :  { %371 = vmatpush.msrb.mxu0 %v342_v22 }
 0x11b   :  { %372 = vmatpush.msrb.mxu0 %v341_v26 }
 0x11c   :  { %v225_v27 = vpop.f32.mrf.mxu2 }
 0x11d   :  { %v226_v30 = vadd.f32 %v462_v1, %v225_v27  ;;  %v267_v1 = vadd.f32 %v467_v18, %v264_v21  ;;  %v395_v27 = vld [vmem:[#allocation2 + $0x2e8] sm:$0xff] }
 0x11e   :  { %402 = vmatpush.msrb.mxu2 %v395_v27 }
 0x11f   :  { %v115_v34 = vpop.f32.mrf.mxu0  ;;  %248 = vmatpush.msra.mxu3 %v226_v30  ;;  %v268_v28 = vmax.f32 %v267_v1, 0.0  ;;  %v393_v30 = vld [vmem:[#allocation2 + $0x2d8] sm:$0xff] }
 0x120   :  { %v116_v37 = vadd.f32 %v463_v32, %v115_v34  ;;  %403 = vmatpush.msrb.mxu2 %v394_v29  ;;  %v391_v32 = vld [vmem:[#allocation2 + $0x2c8] sm:$0xff]  ;;  %v389_v34 = vld [vmem:[#allocation2 + $0x2b8] sm:$0xff] }
 0x121   :  { %249 = vmatpush.msra.mxu3 %v223_v33  ;;  %373 = vmatmul.f32.vlgmr.msrb.gmra.mxu0 %v268_v28  ;;  %v390_v33 = vld [vmem:[#allocation2 + $0x2c0] sm:$0xff] }
 0x122   :  { %141 = vmatpush.msra.mxu1 %v116_v37  ;;  %404 = vmatpush.msrb.mxu2 %v393_v30  ;;  %v386_v37 = vld [vmem:[#allocation2 + $0x2a0] sm:$0xff] }
 0x123   :  { %250 = vmatpush.msra.mxu3 %v220_v38 }
 0x124   :  { %142 = vmatpush.msra.mxu1 %v113_v40  ;;  %405 = vmatpush.msrb.mxu2 %v392_v31  ;;  %v385_v40 = vld [vmem:[#allocation2 + $0x298] sm:$0xff] }
 0x125   :  { %251 = vmatpush.msra.mxu3 %v217_v41  ;;  %v384_v41 = vld [vmem:[#allocation2 + $0x290] sm:$0xff] }
 0x126   :  { %143 = vmatpush.msra.mxu1 %v110_v45  ;;  %441 = vmatmul.msk.f32.vlgmr.msra.gmra.mxu3 %vm125_vm2, %v440_v43  ;;  %v382_v43 = vld [vmem:[#allocation2 + $0x280] sm:$0xff] }
 0x127   :  { %321 = vmatpush.msrb.mxu3 %v284_v46  ;;  %406 = vmatpush.msrb.mxu2 %v391_v32 }
 0x128   :  { %144 = vmatpush.msra.mxu1 %v107_v47 }
 0x129   :  { %439 = vmatmul.msk.f32.vlgmr.msra.gmra.mxu1 %vm125_vm2, %v438_v48  ;;  %322 = vmatpush.msrb.mxu3 %v283_v49  ;;  %v468_v48 = vld [vmem:[#allocation2 + $0x308] ss:$0 sm:$0xff] }
 0x12a   :  { %301 = vmatpush.msrb.mxu1 %v300_v50  ;;  %407 = vmatpush.msrb.mxu2 %v390_v33 }
 0x12b   :  { %323 = vmatpush.msrb.mxu3 %v282_v51 }
 0x12c   :  { %302 = vmatpush.msrb.mxu1 %v299_v52  ;;  %408 = vmatpush.msrb.mxu2 %v389_v34  ;;  %v469_v52 = vld [vmem:[#allocation2 + $0x309] ss:$0 sm:$0xff] }
 0x12d   :  { %324 = vmatpush.msrb.mxu3 %v281_v53 }
 0x12e   :  { %303 = vmatpush.msrb.mxu1 %v298_v54  ;;  %409 = vmatpush.msrb.mxu2 %v388_v35 }
 0x12f   :  { %325 = vmatpush.msrb.mxu3 %v280_v55 }
 0x130   :  { %304 = vmatpush.msrb.mxu1 %v297_v56  ;;  %410 = vmatpush.msrb.mxu2 %v387_v36 }
 0x131   :  { %326 = vmatpush.msrb.mxu3 %v279_v57 }
 0x132   :  { %305 = vmatpush.msrb.mxu1 %v296_v58  ;;  %411 = vmatpush.msrb.mxu2 %v386_v37 }
 0x133   :  { %327 = vmatpush.msrb.mxu3 %v278_v59 }
 0x134   :  { %306 = vmatpush.msrb.mxu1 %v295_v60  ;;  %412 = vmatpush.msrb.mxu2 %v385_v40 }
 0x135   :  { %328 = vmatpush.msrb.mxu3 %v277_v61 }
 0x136   :  { %307 = vmatpush.msrb.mxu1 %v294_v62  ;;  %413 = vmatpush.msrb.mxu2 %v384_v41 }
 0x137   :  { %329 = vmatpush.msrb.mxu3 %v276_v63 }
 0x138   :  { %308 = vmatpush.msrb.mxu1 %v293_v0  ;;  %414 = vmatpush.msrb.mxu2 %v383_v42 }
 0x139   :  { %330 = vmatpush.msrb.mxu3 %v275_v2 }
 0x13a   :  { %309 = vmatpush.msrb.mxu1 %v292_v3  ;;  %415 = vmatpush.msrb.mxu2 %v382_v43 }
 0x13b   :  { %331 = vmatpush.msrb.mxu3 %v274_v4 }
 0x13c   :  { %310 = vmatpush.msrb.mxu1 %v291_v5 }
 0x13d   :  { %332 = vmatpush.msrb.mxu3 %v273_v6 }
 0x13e   :  { %311 = vmatpush.msrb.mxu1 %v290_v7 }
 0x13f   :  { %333 = vmatpush.msrb.mxu3 %v272_v8 }
 0x140   :  { %312 = vmatpush.msrb.mxu1 %v289_v9 }
 0x141   :  { %334 = vmatpush.msrb.mxu3 %v271_v10 }
 0x142   :  { %313 = vmatpush.msrb.mxu1 %v288_v12 }
 0x143   :  { %335 = vmatpush.msrb.mxu3 %v270_v11 }
 0x144   :  { %314 = vmatpush.msrb.mxu1 %v287_v15 }
 0x145   :  { %336 = vmatpush.msrb.mxu3 %v269_v13 }
 0x146   :  { %315 = vmatpush.msrb.mxu1 %v286_v20 }
 0x148   :  { %316 = vmatpush.msrb.mxu1 %v285_v23 }
 0x19e   :  { %v374_v46 = vpop.f32.mrf.mxu0 }
 0x1a6   :  { %v146_v38 = vpop.f32.mrf.mxu1 }
 0x1a7   :  { %337 = vmatmul.f32.vlgmr.msrb.gmra.mxu3 %v146_v38 }
 0x1a9   :  { %v253_v39 = vpop.f32.mrf.mxu3 }
 0x1aa   :  { %317 = vmatmul.f32.vlgmr.msrb.gmra.mxu1 %v253_v39 }
 0x227   :  { %v318_v44 = vpop.f32.mrf.mxu1 }
 0x22a   :  { %v338_v45 = vpop.f32.mrf.mxu3 }
 0x22b   :  { %v339_v47 = vadd.f32 %v338_v45, %v318_v44 }
 0x22d   :  { %v377_v49 = vadd.f32 %v374_v46, %v339_v47 }
 0x22f   :  { %v380_v50 = vadd.f32 %v468_v48, %v377_v49 }
 0x231   :  { %v381_v51 = vmax.f32 %v380_v50, 0.0 }
 0x233   :  { %416 = vmatmul.f32.vlgmr.msrb.gmra.mxu2 %v381_v51 }
 0x2b6   :  { %v417_v53 = vpop.f32.mrf.mxu2 }
 0x2b7   :  { %v418_v54 = vadd.f32 %v469_v52, %v417_v53 }
 0x2b9   :  { %420 = vst [vmem:[#allocation5] sm:$0xff] %v418_v54 }
 0x2ba   :  { %431 = dma.vmem_to_hbm [thread:$0]  %s427_s29, 128, %s429_s5, [#allocation4]  }
 0x2bb   :  { %520 = dma.done.wait [#allocation4], 128  }
 0x2bc   :  { %521 = vsyncadd [#allocation4], 4294967168 }
 0x2bd   :  { %436 = vsyncpa [#allocation3], 1 }
 0x2be   :  { %437 = vsyncpa [#allocation4], 1 }

</bundles_post_ra>
